<compile_context>
chip_gen: v5e
topology: v5e:2x2
jax: 0.10.0
libtpu: 0.0.40
codegen_flags: <defaults>
</compile_context>

<pallas_src>
import functools
import math

import jax
import jax.numpy as jnp
from jax.experimental import pallas as pl
from jax.experimental.pallas import tpu as pltpu


_TILE_F_MAX = 8192   # windows per grid step (lane tile); multiple of 128


def _round_up(x, m):
    return ((x + m - 1) // m) * m


def _choose_tiling(f_need):
    """Pick the lane-tile size / padded window count.

    Aims for at least 2 grid steps when f_need > 128 so the "parallel" grid
    axis can be sharded across v7x's two TensorCores (no effect on v5e/v6e).
    """
    f_ceil = _round_up(max(f_need, 1), 128)
    half = _round_up((f_ceil + 1) // 2, 128)
    tile_f = max(128, min(_TILE_F_MAX, half))
    f_pad = _round_up(f_ceil, tile_f)
    return tile_f, f_pad, f_pad // tile_f


def pos_tile_kernel(w_ref, b_ref, x_ref, h_ref):
    """POS projection for one lane-tile of windows (windows on lanes, time on sublanes).

    w_ref: SMEM (2, 3) float32  -- POS projection weight
    b_ref: SMEM (2,)   float32  -- projection bias
    x_ref: VMEM (3, win_len, tile_f) float32, pre-shifted windows:
               x_ref[c, t, f] = signal[c, tile_start + f + t]
    h_ref: VMEM (win_len, tile_f) float32 output; h[t, f] = value at time-offset t
           of the window starting at position tile_start + f.
    """
    win_len, tile_f = h_ref.shape

    # Temporal normalization Cn = x / mean_t(x) fused with the 3->2 projection:
    # only one channel tile + two accumulators stay live (low vreg/VMEM pressure).
    s0 = jnp.zeros((win_len, tile_f), jnp.float32) + b_ref[0]
    s1 = jnp.zeros((win_len, tile_f), jnp.float32) + b_ref[1]
    for c in range(3):
        xc = x_ref[c]                                            # (win_len, tile_f)
        inv_mean = 1.0 / jnp.mean(xc, axis=0, keepdims=True)     # (1, tile_f), exact
        cn = xc * inv_mean
        s0 = s0 + cn * w_ref[0, c]
        s1 = s1 + cn * w_ref[1, c]

    # Unbiased std ratio (torch .std default); the 1/(win_len-1) factors cancel.
    d0 = s0 - jnp.mean(s0, axis=0, keepdims=True)
    d1 = s1 - jnp.mean(s1, axis=0, keepdims=True)
    ss0 = jnp.sum(d0 * d0, axis=0, keepdims=True)
    ss1 = jnp.sum(d1 * d1, axis=0, keepdims=True)
    ratio = jnp.sqrt(ss0) / jnp.sqrt(ss1)                        # (1, tile_f)

    h = s0 + ratio * s1
    h = h - jnp.mean(h, axis=0, keepdims=True)
    h_ref[...] = h.astype(h_ref.dtype)


def _pos_windows_pallas(x3tf, weight, bias, tile_f, num_tiles):
    """Run POS on a pre-shifted window stack x3tf of shape (3, win_len, f_pad).

    Returns h_all of shape (win_len, f_pad); padded lane columns are garbage/NaN.
    """
    _, win_len, f_pad = x3tf.shape
    return pl.pallas_call(
        pos_tile_kernel,
        out_shape=jax.ShapeDtypeStruct((win_len, f_pad), jnp.float32),
        grid=(num_tiles,),
        in_specs=[
            pl.BlockSpec(memory_space=pltpu.MemorySpace.SMEM),        # weight (2, 3)
            pl.BlockSpec(memory_space=pltpu.MemorySpace.SMEM),        # bias (2,)
            pl.BlockSpec((3, win_len, tile_f), lambda i: (0, 0, i)),  # window tile
        ],
        out_specs=pl.BlockSpec((win_len, tile_f), lambda i: (0, i)),
        compiler_params=pltpu.CompilerParams(
            dimension_semantics=("parallel",)),
    )(weight.astype(jnp.float32), bias.astype(jnp.float32), x3tf)


@functools.partial(jax.jit, static_argnames=("win_len",))
def pos_extractor_forward(rgbs, weight, bias, win_len):
    """JAX/Pallas equivalent of POSExtractor.forward for rgbs of shape (B, N, 3)."""
    B, N, C = rgbs.shape
    assert C == 3
    assert N >= win_len
    rgbs = rgbs.astype(jnp.float32)

    if N == win_len:
        # Each batch row is exactly one window: put the batch directly on lanes,
        # compute exactly B windows (no redundant stride-1 windows, no gather).
        tile_f, f_pad, num_tiles = _choose_tiling(B)
        x = jnp.transpose(rgbs, (2, 1, 0))                        # (3, win_len, B)
        x3tf = jnp.ones((3, win_len, f_pad), jnp.float32).at[:, :, :B].set(x)
        h_all = _pos_windows_pallas(x3tf, weight, bias, tile_f, num_tiles)
        return jnp.transpose(h_all[:, :B], (1, 0))                # (B, win_len)

    # N > win_len: the torch module only supports B == 1 here (squeeze(0)).
    assert B == 1, "N > win_len requires B == 1 (as in the torch module)"
    M = N - win_len                     # torch fold intentionally skips the last window
    tile_f, f_pad, num_tiles = _choose_tiling(M)

    sig = jnp.transpose(rgbs[0], (1, 0))                          # (3, N)
    t_req = f_pad + win_len                                       # >= N
    sig_pad = jnp.ones((3, t_req), jnp.float32).at[:, :N].set(sig)  # ones: no 0-mean NaNs

    # Pre-shifted window stack via win_len dense static slices (no gather, no
    # in-kernel unaligned shifting): x3tf[c, t, f] = sig_pad[c, f + t].
    x3tf = jnp.stack([sig_pad[:, t:t + f_pad] for t in range(win_len)], axis=1)

    h_all = _pos_windows_pallas(x3tf, weight, bias, tile_f, num_tiles)
    h_used = h_all[:, :M]                                         # (win_len, M)

    # Overlap-add fold H[0, m + t] += h[t, m] as win_len dense shifted adds
    # (no duplicate-index scatter).
    H_row = jnp.zeros((N,), jnp.float32)
    for t in range(win_len):
        H_row = H_row.at[t:t + M].add(h_used[t])
    return H_row[None, :]


def pos_extractor_reference(rgbs, weight, bias, win_len):
    """Pure-jnp reference (no Pallas) mirroring the torch module, for sanity checks."""
    B, N, _ = rgbs.shape
    num_win = N - win_len + 1
    idx = jnp.arange(num_win)[:, None] + jnp.arange(win_len)[None, :]
    windows = rgbs[:, idx, :]                                     # (B, num_win, win_len, 3)
    rgb = windows[:, 0] if N == win_len else windows[0]
    cn = rgb / jnp.mean(rgb, axis=1, keepdims=True)
    S = jnp.einsum("fwc,oc->fow", cn, weight) + bias[None, :, None]
    std0 = jnp.std(S[:, 0], axis=1, ddof=1)
    std1 = jnp.std(S[:, 1], axis=1, ddof=1)
    h = S[:, 0] + (std0 / std1)[:, None] * S[:, 1]
    h = h - jnp.mean(h, axis=1, keepdims=True)
    if N == win_len:
        return h
    M = N - win_len
    H = jnp.zeros((B, N), jnp.float32)
    for t in range(win_len):                                      # last window skipped (torch parity)
        H = H.at[0, t:t + M].add(h[:M, t])
    return H


if __name__ == "__main__":
    key = jax.random.PRNGKey(0)
    k1, k2, k3, kb = jax.random.split(key, 4)

    fps = 5.0
    win_len = int(1.6 * fps)          # = 8

    # Fixed POS projection matrix from the module; bias drawn like nn.Linear default.
    weight = jnp.array([[0.0, 1.0, -1.0], [-2.0, 1.0, 1.0]], dtype=jnp.float32)
    bound = 1.0 / math.sqrt(3.0)
    bias = jax.random.uniform(kb, (2,), jnp.float32, minval=-bound, maxval=bound)

    # Case 1: B=1, N > win_len -> overlap-add fold path (single lane tile).
    rgbs1 = jax.random.uniform(k1, (1, 16, 3), jnp.float32, minval=0.5, maxval=1.5)
    H1 = jax.block_until_ready(pos_extractor_forward(rgbs1, weight, bias, win_len))
    H1_ref = pos_extractor_reference(rgbs1, weight, bias, win_len)
    assert H1.shape == (1, 16)
    assert jnp.allclose(H1, H1_ref, rtol=2e-4, atol=2e-4)

    # Case 2: B=2, N == win_len -> specialized batch-on-lanes path.
    rgbs2 = jax.random.uniform(k2, (2, win_len, 3), jnp.float32, minval=0.5, maxval=1.5)
    H2 = jax.block_until_ready(pos_extractor_forward(rgbs2, weight, bias, win_len))
    H2_ref = pos_extractor_reference(rgbs2, weight, bias, win_len)
    assert H2.shape == (2, win_len)
    assert jnp.allclose(H2, H2_ref, rtol=2e-4, atol=2e-4)

    # Case 3: B=1, longer recording -> two lane tiles / grid steps (grid=(2,)).
    rgbs3 = jax.random.uniform(k3, (1, 2500, 3), jnp.float32, minval=0.5, maxval=1.5)
    H3 = jax.block_until_ready(pos_extractor_forward(rgbs3, weight, bias, win_len))
    H3_ref = pos_extractor_reference(rgbs3, weight, bias, win_len)
    assert H3.shape == (1, 2500)
    assert jnp.allclose(H3, H3_ref, rtol=2e-4, atol=2e-4)

    print("KERNEL_OK")
</pallas_src>

<mosaic_0001>
module attributes {stable_mosaic.version = 11 : i64} {
  func.func @pos_tile_kernel(%arg0: i32, %arg1: memref<2x3xf32, #tpu.memory_space<smem>>, %arg2: memref<2xf32, #tpu.memory_space<smem>>, %arg3: memref<3x8x128xf32, #tpu.memory_space<vmem>>, %arg4: memref<8x128xf32, #tpu.memory_space<vmem>>) attributes {dimension_semantics = [#tpu.dimension_semantics<parallel>], iteration_bounds = array<i64: 1>, scalar_prefetch = 0 : i64, scratch_operands = 0 : i64, tpu.core_type = #tpu.core_type<tc>, window_params = [{transform_indices = @transform_0, window_bounds = array<i64: 2, 3>}, {transform_indices = @transform_1, window_bounds = array<i64: 2>}, {transform_indices = @transform_2, window_bounds = array<i64: 3, 8, 128>}, {transform_indices = @transform_3, window_bounds = array<i64: 8, 128>}]} {
    %cst = arith.constant 0.000000e+00 : f32
    %0 = vector.broadcast %cst : f32 to vector<8x128xf32>
    %c0 = arith.constant 0 : index
    %1 = memref.load %arg2[%c0] : memref<2xf32, #tpu.memory_space<smem>>
    %2 = vector.broadcast %1 : f32 to vector<8x128xf32>
    %3 = arith.addf %0, %2 : vector<8x128xf32>
    %cst_0 = arith.constant 0.000000e+00 : f32
    %4 = vector.broadcast %cst_0 : f32 to vector<8x128xf32>
    %c1 = arith.constant 1 : index
    %5 = memref.load %arg2[%c1] : memref<2xf32, #tpu.memory_space<smem>>
    %6 = vector.broadcast %5 : f32 to vector<8x128xf32>
    %7 = arith.addf %4, %6 : vector<8x128xf32>
    %c0_1 = arith.constant 0 : index
    %c0_2 = arith.constant 0 : index
    %c0_3 = arith.constant 0 : index
    %8 = vector.load %arg3[%c0_1, %c0_2, %c0_3] : memref<3x8x128xf32, #tpu.memory_space<vmem>>, vector<1x8x128xf32>
    %9 = vector.shape_cast %8 : vector<1x8x128xf32> to vector<8x128xf32>
    %cst_4 = arith.constant dense<0.000000e+00> : vector<128xf32>
    %10 = vector.multi_reduction <add>, %9, %cst_4 [0] : vector<8x128xf32> to vector<128xf32>
    %11 = vector.shape_cast %10 : vector<128xf32> to vector<1x128xf32>
    %cst_5 = arith.constant 8.000000e+00 : f32
    %12 = vector.broadcast %cst_5 : f32 to vector<1x128xf32>
    %13 = arith.divf %11, %12 : vector<1x128xf32>
    %cst_6 = arith.constant 1.000000e+00 : f32
    %14 = vector.broadcast %cst_6 : f32 to vector<1x128xf32>
    %15 = arith.divf %14, %13 : vector<1x128xf32>
    %16 = vector.broadcast %15 : vector<1x128xf32> to vector<8x128xf32>
    %17 = arith.mulf %9, %16 : vector<8x128xf32>
    %c0_7 = arith.constant 0 : index
    %c0_8 = arith.constant 0 : index
    %18 = memref.load %arg1[%c0_7, %c0_8] : memref<2x3xf32, #tpu.memory_space<smem>>
    %19 = vector.broadcast %18 : f32 to vector<8x128xf32>
    %20 = arith.mulf %17, %19 : vector<8x128xf32>
    %21 = arith.addf %3, %20 : vector<8x128xf32>
    %c1_9 = arith.constant 1 : index
    %c0_10 = arith.constant 0 : index
    %22 = memref.load %arg1[%c1_9, %c0_10] : memref<2x3xf32, #tpu.memory_space<smem>>
    %23 = vector.broadcast %22 : f32 to vector<8x128xf32>
    %24 = arith.mulf %17, %23 : vector<8x128xf32>
    %25 = arith.addf %7, %24 : vector<8x128xf32>
    %c1_11 = arith.constant 1 : index
    %c0_12 = arith.constant 0 : index
    %c0_13 = arith.constant 0 : index
    %26 = vector.load %arg3[%c1_11, %c0_12, %c0_13] : memref<3x8x128xf32, #tpu.memory_space<vmem>>, vector<1x8x128xf32>
    %27 = vector.shape_cast %26 : vector<1x8x128xf32> to vector<8x128xf32>
    %cst_14 = arith.constant dense<0.000000e+00> : vector<128xf32>
    %28 = vector.multi_reduction <add>, %27, %cst_14 [0] : vector<8x128xf32> to vector<128xf32>
    %29 = vector.shape_cast %28 : vector<128xf32> to vector<1x128xf32>
    %cst_15 = arith.constant 8.000000e+00 : f32
    %30 = vector.broadcast %cst_15 : f32 to vector<1x128xf32>
    %31 = arith.divf %29, %30 : vector<1x128xf32>
    %cst_16 = arith.constant 1.000000e+00 : f32
    %32 = vector.broadcast %cst_16 : f32 to vector<1x128xf32>
    %33 = arith.divf %32, %31 : vector<1x128xf32>
    %34 = vector.broadcast %33 : vector<1x128xf32> to vector<8x128xf32>
    %35 = arith.mulf %27, %34 : vector<8x128xf32>
    %c0_17 = arith.constant 0 : index
    %c1_18 = arith.constant 1 : index
    %36 = memref.load %arg1[%c0_17, %c1_18] : memref<2x3xf32, #tpu.memory_space<smem>>
    %37 = vector.broadcast %36 : f32 to vector<8x128xf32>
    %38 = arith.mulf %35, %37 : vector<8x128xf32>
    %39 = arith.addf %21, %38 : vector<8x128xf32>
    %c1_19 = arith.constant 1 : index
    %c1_20 = arith.constant 1 : index
    %40 = memref.load %arg1[%c1_19, %c1_20] : memref<2x3xf32, #tpu.memory_space<smem>>
    %41 = vector.broadcast %40 : f32 to vector<8x128xf32>
    %42 = arith.mulf %35, %41 : vector<8x128xf32>
    %43 = arith.addf %25, %42 : vector<8x128xf32>
    %c2 = arith.constant 2 : index
    %c0_21 = arith.constant 0 : index
    %c0_22 = arith.constant 0 : index
    %44 = vector.load %arg3[%c2, %c0_21, %c0_22] : memref<3x8x128xf32, #tpu.memory_space<vmem>>, vector<1x8x128xf32>
    %45 = vector.shape_cast %44 : vector<1x8x128xf32> to vector<8x128xf32>
    %cst_23 = arith.constant dense<0.000000e+00> : vector<128xf32>
    %46 = vector.multi_reduction <add>, %45, %cst_23 [0] : vector<8x128xf32> to vector<128xf32>
    %47 = vector.shape_cast %46 : vector<128xf32> to vector<1x128xf32>
    %cst_24 = arith.constant 8.000000e+00 : f32
    %48 = vector.broadcast %cst_24 : f32 to vector<1x128xf32>
    %49 = arith.divf %47, %48 : vector<1x128xf32>
    %cst_25 = arith.constant 1.000000e+00 : f32
    %50 = vector.broadcast %cst_25 : f32 to vector<1x128xf32>
    %51 = arith.divf %50, %49 : vector<1x128xf32>
    %52 = vector.broadcast %51 : vector<1x128xf32> to vector<8x128xf32>
    %53 = arith.mulf %45, %52 : vector<8x128xf32>
    %c0_26 = arith.constant 0 : index
    %c2_27 = arith.constant 2 : index
    %54 = memref.load %arg1[%c0_26, %c2_27] : memref<2x3xf32, #tpu.memory_space<smem>>
    %55 = vector.broadcast %54 : f32 to vector<8x128xf32>
    %56 = arith.mulf %53, %55 : vector<8x128xf32>
    %57 = arith.addf %39, %56 : vector<8x128xf32>
    %c1_28 = arith.constant 1 : index
    %c2_29 = arith.constant 2 : index
    %58 = memref.load %arg1[%c1_28, %c2_29] : memref<2x3xf32, #tpu.memory_space<smem>>
    %59 = vector.broadcast %58 : f32 to vector<8x128xf32>
    %60 = arith.mulf %53, %59 : vector<8x128xf32>
    %61 = arith.addf %43, %60 : vector<8x128xf32>
    %cst_30 = arith.constant dense<0.000000e+00> : vector<128xf32>
    %62 = vector.multi_reduction <add>, %57, %cst_30 [0] : vector<8x128xf32> to vector<128xf32>
    %63 = vector.shape_cast %62 : vector<128xf32> to vector<1x128xf32>
    %cst_31 = arith.constant 8.000000e+00 : f32
    %64 = vector.broadcast %cst_31 : f32 to vector<1x128xf32>
    %65 = arith.divf %63, %64 : vector<1x128xf32>
    %66 = vector.broadcast %65 : vector<1x128xf32> to vector<8x128xf32>
    %67 = arith.subf %57, %66 : vector<8x128xf32>
    %cst_32 = arith.constant dense<0.000000e+00> : vector<128xf32>
    %68 = vector.multi_reduction <add>, %61, %cst_32 [0] : vector<8x128xf32> to vector<128xf32>
    %69 = vector.shape_cast %68 : vector<128xf32> to vector<1x128xf32>
    %cst_33 = arith.constant 8.000000e+00 : f32
    %70 = vector.broadcast %cst_33 : f32 to vector<1x128xf32>
    %71 = arith.divf %69, %70 : vector<1x128xf32>
    %72 = vector.broadcast %71 : vector<1x128xf32> to vector<8x128xf32>
    %73 = arith.subf %61, %72 : vector<8x128xf32>
    %74 = arith.mulf %67, %67 : vector<8x128xf32>
    %cst_34 = arith.constant dense<0.000000e+00> : vector<128xf32>
    %75 = vector.multi_reduction <add>, %74, %cst_34 [0] : vector<8x128xf32> to vector<128xf32>
    %76 = vector.shape_cast %75 : vector<128xf32> to vector<1x128xf32>
    %77 = arith.mulf %73, %73 : vector<8x128xf32>
    %cst_35 = arith.constant dense<0.000000e+00> : vector<128xf32>
    %78 = vector.multi_reduction <add>, %77, %cst_35 [0] : vector<8x128xf32> to vector<128xf32>
    %79 = vector.shape_cast %78 : vector<128xf32> to vector<1x128xf32>
    %80 = math.sqrt %76 : vector<1x128xf32>
    %81 = math.sqrt %79 : vector<1x128xf32>
    %82 = arith.divf %80, %81 : vector<1x128xf32>
    %83 = vector.broadcast %82 : vector<1x128xf32> to vector<8x128xf32>
    %84 = arith.mulf %83, %61 : vector<8x128xf32>
    %85 = arith.addf %57, %84 : vector<8x128xf32>
    %cst_36 = arith.constant dense<0.000000e+00> : vector<128xf32>
    %86 = vector.multi_reduction <add>, %85, %cst_36 [0] : vector<8x128xf32> to vector<128xf32>
    %87 = vector.shape_cast %86 : vector<128xf32> to vector<1x128xf32>
    %cst_37 = arith.constant 8.000000e+00 : f32
    %88 = vector.broadcast %cst_37 : f32 to vector<1x128xf32>
    %89 = arith.divf %87, %88 : vector<1x128xf32>
    %90 = vector.broadcast %89 : vector<1x128xf32> to vector<8x128xf32>
    %91 = arith.subf %85, %90 : vector<8x128xf32>
    %c0_38 = arith.constant 0 : index
    %c0_39 = arith.constant 0 : index
    %92 = vector.load %arg4[%c0_38, %c0_39] : memref<8x128xf32, #tpu.memory_space<vmem>>, vector<8x128xf32>
    tpu.vector_store %arg4[%c0_38, %c0_39], %91 {strides = array<i32>} : memref<8x128xf32, #tpu.memory_space<vmem>>, vector<8x128xf32>,
    return
  }
  func.func @transform_0(%arg0: i32) -> (i32, i32) {
    %c0_i32 = arith.constant 0 : i32
    %c0_i32_0 = arith.constant 0 : i32
    %c0_i32_1 = arith.constant 0 : i32
    return %c0_i32, %c0_i32_0 : i32, i32
  }
  func.func @transform_1(%arg0: i32) -> i32 {
    %c0_i32 = arith.constant 0 : i32
    %c0_i32_0 = arith.constant 0 : i32
    return %c0_i32 : i32
  }
  func.func @transform_2(%arg0: i32) -> (i32, i32, i32) {
    %c0_i32 = arith.constant 0 : i32
    %c0_i32_0 = arith.constant 0 : i32
    %c0_i32_1 = arith.constant 0 : i32
    return %c0_i32, %c0_i32_0, %arg0 : i32, i32, i32
  }
  func.func @transform_3(%arg0: i32) -> (i32, i32) {
    %c0_i32 = arith.constant 0 : i32
    %c0_i32_0 = arith.constant 0 : i32
    return %c0_i32, %arg0 : i32, i32
  }
}

</mosaic_0001>

<bundles_post_ra>
// kernel: pos_extractor_forward.1
= control target key start
LH: loop header
LB: loop body
LE: loop exit
PB: predicated region body
PF: predicated region fallthrough
CT: control target
= control target key end

     0   :  { %8 = vsyncpa [#allocation3], 0  ;;  %s410_s0 = inlined_call_operand.vmem [shape: f32[2,3], index: 0, kind: input, shape index: {}]   ;;  %s411_s1 = inlined_call_operand.vmem [shape: f32[2], index: 1, kind: input, shape index: {}]   ;;  %s412_s2 = inlined_call_operand.vmem [shape: f32[3,8,128], index: 2, kind: input, shape index: {}]   ;;  %s413_s3 = inlined_call_operand.vmem [shape: f32[8,128], index: 3, kind: output, shape index: {}]  }
   0x1   :  { %s15_s14 = sshll.u32 %s410_s0, 4  ;;  %s16_s14 = int_to_ptr.vmem [resolvable:$true] %s15_s14 }
   0x2   :  { %9 = vsyncpa [#allocation5], 0  ;;  %s24_s17 = sshll.u32 %s411_s1, 4  ;;  %s289_s18 = smov [#allocation2]   ;;  %s25_s17 = int_to_ptr.vmem [resolvable:$true] %s24_s17 }
   0x3   :  { %18 = dma.vmem_to_smem %s16_s14, 32, %s289_s18, [#allocation3]  }
   0x4   :  { %s290_s19 = smov [#allocation4]  }
   0x5   :  { %27 = dma.vmem_to_smem %s25_s17, 16, %s290_s19, [#allocation5]  }
   0x6   :  { %285 = dma.done.wait [#allocation3], 32  }
   0x7   :  { %286 = vsyncadd [#allocation3], 4294967264 }
   0x8   :  { %287 = dma.done.wait [#allocation5], 16  }
   0x9   :  { %288 = vsyncadd [#allocation5], 4294967280 }
   0xa   :  { %38 = sfence }
   0xb   :  { %v321_v0 = vld [vmem:[%s412_s2] sm:$0xff]  ;;  %v326_v1 = vld [vmem:[%s412_s2 + $0x8] sm:$0xff]  ;;  %v331_v2 = vld [vmem:[%s412_s2 + $0x10] sm:$0xff]  ;;  %v291_v4 = vmov 8.0   ;;  %s344_s2 = sld [smem:[#allocation4]] }
   0xc   :  { %v46_v3 = vrot.slane %v321_v0, 4  ;;  %247 = vrcp.f32 %v291_v4  ;;  %v86_v5 = vrot.slane %v326_v1, 4  ;;  %v119_v6 = vrot.slane %v331_v2, 4  ;;  %s346_s24 = sld [smem:[#allocation4 + $0x1]] }
   0xd   :  { %s348_s25 = sld [smem:[#allocation2]] }
   0xe   :  { %v47_v7 = vadd.f32 %v46_v3, %v321_v0  ;;  %v87_v8 = vadd.f32 %v326_v1, %v86_v5  ;;  %v120_v9 = vadd.f32 %v331_v2, %v119_v6  ;;  %s350_s26 = sld [smem:[#allocation2 + $0x80]] }
   0xf   :  { %s352_s27 = sld [smem:[#allocation2 + $0x1]] }
  0x10   :  { %v48_v10 = vrot.slane %v47_v7, 2  ;;  %v88_v11 = vrot.slane %v87_v8, 2  ;;  %v121_v12 = vrot.slane %v120_v9, 2  ;;  %s354_s28 = sld [smem:[#allocation2 + $0x81]] }
  0x11   :  { %s356_s29 = sld [smem:[#allocation2 + $0x2]]  ;;  %v40_v47 = vstv %s344_s2 }
  0x12   :  { %v248_v13 = vpop.eup %247  ;;  %v49_v14 = vadd.f32 %v48_v10, %v47_v7  ;;  %v89_v15 = vadd.f32 %v88_v11, %v87_v8  ;;  %v122_v16 = vadd.f32 %v121_v12, %v120_v9  ;;  %s358_s30 = sld [smem:[#allocation2 + $0x82]]  ;;  %v43_v55 = vstv %s346_s24 }
  0x13   :  { %v53_v17 = vmul.f32 8.0, %v248_v13  ;;  %vm57_vm0 = vweird.f32 %v248_v13  ;;  %v77_v60 = vstv %s348_s25 }
  0x14   :  { %v50_v18 = vrot.slane %v49_v14, 1  ;;  %v90_v19 = vrot.slane %v89_v15, 1  ;;  %v123_v20 = vrot.slane %v122_v16, 1  ;;  %v81_v63 = vstv %s350_s26 }
  0x15   :  { %v54_v21 = vsub.f32 1.0, %v53_v17  ;;  %v110_v4 = vstv %s352_s27 }
  0x16   :  { %v51_v23 = vadd.f32 %v50_v18, %v49_v14  ;;  %v91_v24 = vadd.f32 %v90_v19, %v89_v15  ;;  %v124_v25 = vadd.f32 %v123_v20, %v122_v16  ;;  %v114_v7 = vstv %s354_s28 }
  0x17   :  { %v55_v22 = vmul.f32 %v248_v13, %v54_v21  ;;  %v143_v11 = vstv %s356_s29 }
  0x18   :  { %v147_v12 = vstv %s358_s30 }
  0x19   :  { %v56_v26 = vadd.f32 %v248_v13, %v55_v22 }
  0x1b   :  { %v339_v27 = vsel %vm57_vm0, %v248_v13, %v56_v26 }
  0x1c   :  { %v59_v28 = vmul.f32 %v339_v27, %v51_v23  ;;  %v92_v29 = vmul.f32 %v91_v24, %v339_v27  ;;  %v125_v30 = vmul.f32 %v124_v25, %v339_v27 }
  0x1e   :  { %249 = vrcp.f32 %v59_v28  ;;  %vm65_vm1 = vweird.f32 %v59_v28  ;;  %v69_v34 = vand.u32 2147483647, %v59_v28  ;;  %v71_v36 = vand.u32 2147483648, %v59_v28 }
  0x1f   :  { %251 = vrcp.f32 %v92_v29  ;;  %vm98_vm2 = vweird.f32 %v92_v29  ;;  %v102_v38 = vand.u32 2147483647, %v92_v29  ;;  %v104_v40 = vand.u32 2147483648, %v92_v29 }
  0x20   :  { %253 = vrcp.f32 %v125_v30  ;;  %vm131_vm5 = vweird.f32 %v125_v30  ;;  %v137_v43 = vand.u32 2147483648, %v125_v30  ;;  %v135_v46 = vand.u32 2147483647, %v125_v30 }
  0x21   :  { %v72_v49 = vor.u32 1.1754944e-38, %v71_v36  ;;  %vm70_vm8 = vcmp.eq.f32.partialorder %v69_v34, 8.507059e+37  ;;  %v105_v53 = vor.u32 1.1754944e-38, %v104_v40  ;;  %vm103_vm10 = vcmp.eq.f32.partialorder %v102_v38, 8.507059e+37 }
  0x22   :  { %v138_v58 = vor.u32 1.1754944e-38, %v137_v43  ;;  %vm136_vm12 = vcmp.eq.f32.partialorder %v135_v46, 8.507059e+37 }
  0x24   :  { %v250_v31 = vpop.eup %249 }
  0x25   :  { %v252_v32 = vpop.eup %251  ;;  %v61_v33 = vmul.f32 %v250_v31, %v59_v28  ;;  %vm66_vm3 = vweird.f32 %v250_v31 }
  0x26   :  { %v254_v35 = vpop.eup %253  ;;  %v94_v37 = vmul.f32 %v252_v32, %v92_v29  ;;  %vm99_vm4 = vweird.f32 %v252_v32  ;;  %vm362_vm7 = vmor %vm65_vm1, %vm66_vm3 }
  0x27   :  { %v62_v39 = vsub.f32 1.0, %v61_v33  ;;  %v127_v41 = vmul.f32 %v254_v35, %v125_v30  ;;  %vm132_vm6 = vweird.f32 %v254_v35  ;;  %vm367_vm9 = vmor %vm98_vm2, %vm99_vm4 }
  0x28   :  { %v95_v42 = vsub.f32 1.0, %v94_v37  ;;  %vm373_vm11 = vmor %vm131_vm5, %vm132_vm6 }
  0x29   :  { %v63_v44 = vmul.f32 %v250_v31, %v62_v39  ;;  %v128_v45 = vsub.f32 1.0, %v127_v41 }
  0x2a   :  { %v96_v50 = vmul.f32 %v252_v32, %v95_v42 }
  0x2b   :  { %v64_v51 = vadd.f32 %v250_v31, %v63_v44  ;;  %v129_v54 = vmul.f32 %v254_v35, %v128_v45 }
  0x2c   :  { %v97_v56 = vadd.f32 %v252_v32, %v96_v50 }
  0x2d   :  { %v68_v59 = vsel %vm362_vm7, %v250_v31, %v64_v51  ;;  %v130_v61 = vadd.f32 %v254_v35, %v129_v54 }
  0x2e   :  { %v73_v62 = vsel %vm70_vm8, %v72_v49, %v68_v59  ;;  %v101_v3 = vsel %vm367_vm9, %v252_v32, %v97_v56 }
  0x2f   :  { %v75_v5 = vmul.f32 %v73_v62, %v321_v0  ;;  %v106_v6 = vsel %vm103_vm10, %v105_v53, %v101_v3  ;;  %v134_v8 = vsel %vm373_vm11, %v254_v35, %v130_v61 }
  0x30   :  { %v108_v9 = vmul.f32 %v326_v1, %v106_v6  ;;  %v139_v10 = vsel %vm136_vm12, %v138_v58, %v134_v8 }
  0x31   :  { %v78_v13 = vmul.f32 %v77_v60, %v75_v5  ;;  %v82_v14 = vmul.f32 %v81_v63, %v75_v5  ;;  %v141_v15 = vmul.f32 %v331_v2, %v139_v10 }
  0x32   :  { %v111_v16 = vmul.f32 %v110_v4, %v108_v9  ;;  %v115_v17 = vmul.f32 %v114_v7, %v108_v9 }
  0x33   :  { %v79_v18 = vadd.f32 %v78_v13, %v40_v47  ;;  %v83_v19 = vadd.f32 %v82_v14, %v43_v55  ;;  %v144_v20 = vmul.f32 %v143_v11, %v141_v15  ;;  %v148_v0 = vmul.f32 %v147_v12, %v141_v15 }
  0x35   :  { %v112_v21 = vadd.f32 %v111_v16, %v79_v18  ;;  %v116_v22 = vadd.f32 %v115_v17, %v83_v19 }
  0x37   :  { %v392_v23 = vadd.f32 %v144_v20, %v112_v21  ;;  %v394_v24 = vadd.f32 %v148_v0, %v116_v22 }
  0x39   :  { %v150_v1 = vrot.slane %v392_v23, 4  ;;  %v158_v25 = vrot.slane %v394_v24, 4 }
  0x3b   :  { %v151_v26 = vadd.f32 %v150_v1, %v392_v23  ;;  %v159_v2 = vadd.f32 %v158_v25, %v394_v24 }
  0x3d   :  { %v152_v28 = vrot.slane %v151_v26, 2  ;;  %v160_v29 = vrot.slane %v159_v2, 2 }
  0x3f   :  { %v153_v30 = vadd.f32 %v152_v28, %v151_v26  ;;  %v161_v31 = vadd.f32 %v160_v29, %v159_v2 }
  0x41   :  { %v154_v32 = vrot.slane %v153_v30, 1  ;;  %v162_v33 = vrot.slane %v161_v31, 1 }
  0x43   :  { %v155_v34 = vadd.f32 %v154_v32, %v153_v30  ;;  %v163_v35 = vadd.f32 %v162_v33, %v161_v31 }
  0x45   :  { %v156_v36 = vmul.f32 %v155_v34, %v339_v27  ;;  %v164_v37 = vmul.f32 %v163_v35, %v339_v27 }
  0x47   :  { %v157_v38 = vsub.f32 %v392_v23, %v156_v36  ;;  %v165_v39 = vsub.f32 %v394_v24, %v164_v37 }
  0x49   :  { %v166_v40 = vmul.f32 %v157_v38, %v157_v38  ;;  %v173_v41 = vmul.f32 %v165_v39, %v165_v39 }
  0x4b   :  { %v167_v42 = vrot.slane %v166_v40, 4  ;;  %v174_v43 = vrot.slane %v173_v41, 4 }
  0x4d   :  { %v168_v44 = vadd.f32 %v167_v42, %v166_v40  ;;  %v175_v45 = vadd.f32 %v174_v43, %v173_v41 }
  0x4f   :  { %v169_v46 = vrot.slane %v168_v44, 2  ;;  %v176_v47 = vrot.slane %v175_v45, 2 }
  0x51   :  { %v170_v48 = vadd.f32 %v169_v46, %v168_v44  ;;  %v177_v49 = vadd.f32 %v176_v47, %v175_v45 }
  0x53   :  { %v171_v50 = vrot.slane %v170_v48, 1  ;;  %v178_v51 = vrot.slane %v177_v49, 1 }
  0x55   :  { %v172_v52 = vadd.f32 %v171_v50, %v170_v48  ;;  %v179_v53 = vadd.f32 %v178_v51, %v177_v49 }
  0x57   :  { %255 = vrsqrt.f32 %v172_v52  ;;  %vm199_vm13 = vcmp.eq.f32.partialorder %v179_v53, inf  ;;  %v202_v3 = vand.u32 2147483648, %v179_v53  ;;  %vm201_vm14 = vcmp.eq.f32.partialorder %v179_v53, 0.0 }
  0x58   :  { %257 = vrsqrt.f32 %v179_v53  ;;  %vm187_vm15 = vcmp.eq.f32.partialorder %v172_v52, inf  ;;  %v190_v15 = vand.u32 2147483648, %v172_v52  ;;  %vm189_vm2 = vcmp.eq.f32.partialorder %v172_v52, 0.0 }
  0x5d   :  { %v256_v54 = vpop.eup %255 }
  0x5e   :  { %v258_v55 = vpop.eup %257  ;;  %v181_v57 = vmul.f32 %v256_v54, %v172_v52 }
  0x5f   :  { %v193_v56 = vmul.f32 %v258_v55, %v179_v53 }
  0x60   :  { %v182_v60 = vmul.f32 %v256_v54, %v181_v57 }
  0x61   :  { %v194_v58 = vmul.f32 %v258_v55, %v193_v56 }
  0x62   :  { %v183_v63 = vmul.f32 0.5, %v182_v60 }
  0x63   :  { %v195_v59 = vmul.f32 0.5, %v194_v58 }
  0x64   :  { %v184_v6 = vsub.f32 1.5, %v183_v63 }
  0x65   :  { %v196_v61 = vsub.f32 1.5, %v195_v59 }
  0x66   :  { %v185_v8 = vmul.f32 %v256_v54, %v184_v6 }
  0x67   :  { %v197_v62 = vmul.f32 %v258_v55, %v196_v61 }
  0x68   :  { %v186_v10 = vmul.f32 %v185_v8, %v172_v52 }
  0x69   :  { %v198_v4 = vmul.f32 %v197_v62, %v179_v53 }
  0x6a   :  { %v188_v16 = vsel %vm187_vm15, %v172_v52, %v186_v10 }
  0x6b   :  { %v200_v5 = vsel %vm199_vm13, %v179_v53, %v198_v4  ;;  %v191_v20 = vsel %vm189_vm2, %v190_v15, %v188_v16 }
  0x6c   :  { %v203_v7 = vsel %vm201_vm14, %v202_v3, %v200_v5 }
  0x6d   :  { %259 = vrcp.f32 %v203_v7  ;;  %v215_v12 = vand.u32 2147483648, %v203_v7  ;;  %vm209_vm0 = vweird.f32 %v203_v7  ;;  %v213_v14 = vand.u32 2147483647, %v203_v7 }
  0x6f   :  { %v216_v18 = vor.u32 1.1754944e-38, %v215_v12  ;;  %vm214_vm4 = vcmp.eq.f32.partialorder %v213_v14, 8.507059e+37 }
  0x73   :  { %v260_v9 = vpop.eup %259 }
  0x74   :  { %v205_v11 = vmul.f32 %v260_v9, %v203_v7  ;;  %vm210_vm1 = vweird.f32 %v260_v9 }
  0x75   :  { %vm211_vm3 = vmor %vm209_vm0, %vm210_vm1 }
  0x76   :  { %v206_v13 = vsub.f32 1.0, %v205_v11 }
  0x78   :  { %v207_v17 = vmul.f32 %v260_v9, %v206_v13 }
  0x7a   :  { %v208_v19 = vadd.f32 %v260_v9, %v207_v17 }
  0x7c   :  { %v212_v0 = vsel %vm211_vm3, %v260_v9, %v208_v19 }
  0x7d   :  { %v217_v21 = vsel %vm214_vm4, %v216_v18, %v212_v0 }
  0x7e   :  { %v218_v22 = vmul.f32 %v217_v21, %v191_v20 }
  0x80   :  { %v219_v1 = vmul.f32 %v218_v22, %v394_v24 }
  0x82   :  { %v220_v25 = vadd.f32 %v219_v1, %v392_v23 }
  0x84   :  { %v221_v26 = vrot.slane %v220_v25, 4 }
  0x86   :  { %v222_v2 = vadd.f32 %v221_v26, %v220_v25 }
  0x88   :  { %v223_v28 = vrot.slane %v222_v2, 2 }
  0x8a   :  { %v224_v29 = vadd.f32 %v223_v28, %v222_v2 }
  0x8c   :  { %v225_v30 = vrot.slane %v224_v29, 1 }
  0x8e   :  { %v226_v31 = vadd.f32 %v225_v30, %v224_v29 }
  0x90   :  { %v227_v32 = vmul.f32 %v226_v31, %v339_v27 }
  0x92   :  { %v228_v33 = vsub.f32 %v220_v25, %v227_v32 }
  0x94   :  { %229 = vst [vmem:[%s413_s3] sm:$0xff] %v228_v33 }
  0x95   :  { %234 = vsyncpa [#allocation3], 1 }
  0x96   :  { %235 = vsyncpa [#allocation5], 1 }

</bundles_post_ra>
